<compile_context>
chip_gen: v7x
topology: tpu7x:2x2x1
jax: 0.10.0
libtpu: 0.0.40
codegen_flags: <defaults>
</compile_context>

<pallas_src>
import functools

import jax
import jax.numpy as jnp
from jax.experimental import pallas as pl
from jax.experimental.pallas import tpu as pltpu


def _sepconv_kernel(x_ref, idx_ref, wdw_ref, bdw_ref, wpw_ref, bpw_ref, out_ref,
                    *, H, W, KH, KW, B, C_in, C_out, pad, compute_dtype):
    # x_ref:   (1, B*C_in, HW)    B images, channels stacked on sublanes, spatial on lanes
    # idx_ref: (2, HW) int32      row 0 = h index, row 1 = w index (precomputed, no //, %)
    # wdw_ref: (KH*KW, B*C_in, 1) depthwise weights, tiled to B*C_in rows
    # bdw_ref: (B*C_in, 1)        depthwise bias, tiled
    # wpw_ref: (C_out, C_in)      pointwise (1x1) weights
    # bpw_ref: (C_out, 1)         pointwise bias
    # out_ref: (1, B*C_out, HW)   lane-dense output (HW multiple of 128 here)
    HW = H * W
    x = x_ref[0].astype(compute_dtype)                      # (B*C_in, HW)

    h_idx = idx_ref[0:1, :]                                 # (1, HW)
    w_idx = idx_ref[1:2, :]                                 # (1, HW)

    # Hoisted border masks (replace the zero padding); one compare per distance,
    # shared by all taps -- no per-tap iota compares.
    left_ok = {d: w_idx >= d for d in range(1, pad + 1)}
    right_ok = {d: w_idx < W - d for d in range(1, pad + 1)}
    top_ok = {d: h_idx >= d for d in range(1, pad + 1)}
    bot_ok = {d: h_idx < H - d for d in range(1, pad + 1)}

    zero = jnp.zeros((), compute_dtype)
    acc = jnp.zeros((B * C_in, HW), jnp.float32)            # f32 accumulator
    for kh in range(KH):
        dh = kh - pad
        for kw in range(KW):
            dw = kw - pad
            off = dh * W + dw
            # tap[p] = x[p + off] via a lane roll (XLU slot); zeros outside the
            # image via the hoisted masks (padding folded into the kernel).
            tap = x if off == 0 else pltpu.roll(x, (-off) % HW, 1)
            masks = []
            if dw < 0:
                masks.append(left_ok[-dw])
            elif dw > 0:
                masks.append(right_ok[dw])
            if dh < 0:
                masks.append(top_ok[-dh])
            elif dh > 0:
                masks.append(bot_ok[dh])
            if masks:
                valid = masks[0]
                for m in masks[1:]:
                    valid = valid & m
                tap = jnp.where(valid, tap, zero)
            w_tap = wdw_ref[kh * KW + kw].astype(compute_dtype)   # (B*C_in, 1)
            acc = acc + (tap * w_tap).astype(jnp.float32)
    dwc = acc + bdw_ref[...]                                # (B*C_in, HW) f32

    # ---- pointwise 1x1: (C_out, C_in) @ (C_in, HW) per image on the MXU ----
    # bf16 operands (MXU-native on all generations), f32 accumulation.
    dwc_bf = dwc.astype(jnp.bfloat16)
    wpw_bf = wpw_ref[...].astype(jnp.bfloat16)
    bpw = bpw_ref[...]                                      # (C_out, 1) f32
    for b in range(B):                                      # B is small and static
        blk = dwc_bf[b * C_in:(b + 1) * C_in, :]            # (C_in, HW)
        pw = jnp.dot(wpw_bf, blk, preferred_element_type=jnp.float32)
        out_ref[0, b * C_out:(b + 1) * C_out, :] = (pw + bpw).astype(out_ref.dtype)


def _pick_block_batch(N, C_in, C_out, HW, itemsize=4):
    """Largest divisor of N whose in+out block fits a VMEM budget, keeping >=2 grid steps."""
    per_img = (C_in + C_out) * HW * itemsize
    budget = 12 * 1024 * 1024          # per-step in+out block; pipeline double-buffers it
    best = 1
    for b in range(1, N + 1):
        if N % b:
            continue
        if b * per_img > budget:
            continue
        if N >= 2 and (N // b) < 2:    # keep >= 2 grid steps (v7x: 2 TCs per chip)
            continue
        best = b
    return best


def _default_compute_dtype():
    """bf16 depthwise VALU math on bf16-native chips (v6e/v7x), f32 elsewhere (v5e...)."""
    try:
        kind = jax.devices()[0].device_kind.lower()
    except Exception:
        return jnp.float32
    if "v6" in kind or "v7" in kind:
        return jnp.bfloat16
    return jnp.float32


@functools.partial(jax.jit,
                   static_argnames=("padding", "block_batch", "compute_dtype"))
def seperable_conv2d(x_nchw, w_dw, b_dw, w_pw, b_pw, *, padding=1,
                     block_batch=None, compute_dtype=jnp.float32):
    """x_nchw: (N, C_in, H, W). w_dw: (C_in, 1, K, K). w_pw: (C_out, C_in, 1, 1)."""
    N, C_in, H, W = x_nchw.shape
    KH, KW = w_dw.shape[2], w_dw.shape[3]
    C_out = w_pw.shape[0]
    if KH != KW or 2 * padding != KH - 1:
        raise NotImplementedError("kernel supports stride=1 'same' padding only")
    HW = H * W

    B = block_batch if block_batch is not None else _pick_block_batch(N, C_in, C_out, HW)
    if N % B:
        raise ValueError("block_batch must divide the batch size")

    # Free (metadata-only) reshape of x; tiny weight/index re-layouts (no HBM pass over x).
    x_blk = x_nchw.reshape(N // B, B * C_in, HW)

    lane = jnp.arange(HW, dtype=jnp.int32)
    hw_idx = jnp.stack([lane // W, lane % W], axis=0)       # (2, HW), computed once outside

    w_taps = jnp.transpose(w_dw[:, 0, :, :], (1, 2, 0)).reshape(KH * KW, C_in)
    wdw_k = jnp.tile(w_taps, (1, B))[:, :, None]            # (KH*KW, B*C_in, 1)
    bdw_k = jnp.tile(b_dw, B).reshape(B * C_in, 1)          # (B*C_in, 1)
    wpw_k = w_pw[:, :, 0, 0]                                # (C_out, C_in)
    bpw_k = b_pw.reshape(C_out, 1)                          # (C_out, 1)

    kernel = functools.partial(
        _sepconv_kernel, H=H, W=W, KH=KH, KW=KW, B=B,
        C_in=C_in, C_out=C_out, pad=padding, compute_dtype=compute_dtype)

    # Explicit scoped-VMEM limit sized to the double-buffered blocks (v5e default is 16 MiB).
    in_block = B * C_in * HW * 4
    out_block = B * C_out * HW * 4
    weight_bytes = 4 * (KH * KW * B * C_in + B * C_in + C_out * C_in + C_out + 2 * HW)
    vmem_limit = 4 * (in_block + out_block) + 4 * weight_bytes + (4 << 20)
    vmem_limit = min(64 << 20, max(32 << 20, vmem_limit))

    out_blk = pl.pallas_call(
        kernel,
        out_shape=jax.ShapeDtypeStruct((N // B, B * C_out, HW), jnp.float32),
        grid_spec=pltpu.PrefetchScalarGridSpec(
            num_scalar_prefetch=0,
            grid=(N // B,),
            in_specs=[
                pl.BlockSpec((1, B * C_in, HW), lambda n: (n, 0, 0)),
                pl.BlockSpec((2, HW), lambda n: (0, 0)),
                pl.BlockSpec((KH * KW, B * C_in, 1), lambda n: (0, 0, 0)),
                pl.BlockSpec((B * C_in, 1), lambda n: (0, 0)),
                pl.BlockSpec((C_out, C_in), lambda n: (0, 0)),
                pl.BlockSpec((C_out, 1), lambda n: (0, 0)),
            ],
            out_specs=pl.BlockSpec((1, B * C_out, HW), lambda n: (n, 0, 0)),
        ),
        compiler_params=pltpu.CompilerParams(
            dimension_semantics=("parallel",),
            vmem_limit_bytes=vmem_limit),
    )(x_blk, hw_idx, wdw_k, bdw_k, wpw_k, bpw_k)

    return out_blk.reshape(N, C_out, H, W)                  # free reshape


def _reference(x_nchw, w_dw, b_dw, w_pw, b_pw, *, padding=1):
    C_in = x_nchw.shape[1]
    C_out = w_pw.shape[0]
    dw = jax.lax.conv_general_dilated(
        x_nchw, w_dw, window_strides=(1, 1),
        padding=((padding, padding), (padding, padding)),
        feature_group_count=C_in,
        dimension_numbers=("NCHW", "OIHW", "NCHW"))
    dw = dw + b_dw.reshape(1, C_in, 1, 1)
    pw = jax.lax.conv_general_dilated(
        dw, w_pw, window_strides=(1, 1), padding="VALID",
        dimension_numbers=("NCHW", "OIHW", "NCHW"))
    return pw + b_pw.reshape(1, C_out, 1, 1)


if __name__ == "__main__":
    # Small shapes consistent with the module: N=2, C_in=4, C_out=8, H=W=16, k=3.
    N, C_in, C_out, H, W, K = 2, 4, 8, 16, 16, 3

    key = jax.random.PRNGKey(0)
    kx, k1, k2, k3, k4 = jax.random.split(key, 5)

    x = jax.random.normal(kx, (N, C_in, H, W), jnp.float32)
    w_dw = 0.1 * jax.random.normal(k1, (C_in, 1, K, K), jnp.float32)      # depthwise
    b_dw = 0.1 * jax.random.normal(k2, (C_in,), jnp.float32)
    w_pw = 0.1 * jax.random.normal(k3, (C_out, C_in, 1, 1), jnp.float32)  # pointwise
    b_pw = 0.1 * jax.random.normal(k4, (C_out,), jnp.float32)

    cd = _default_compute_dtype()
    try:
        out = jax.block_until_ready(
            seperable_conv2d(x, w_dw, b_dw, w_pw, b_pw, padding=1, compute_dtype=cd))
    except Exception:
        # Safety net: fall back to all-f32 depthwise math if the bf16 VALU path
        # is unsupported on this chip generation.
        out = jax.block_until_ready(
            seperable_conv2d(x, w_dw, b_dw, w_pw, b_pw, padding=1,
                             compute_dtype=jnp.float32))

    ref = jax.block_until_ready(_reference(x, w_dw, b_dw, w_pw, b_pw, padding=1))
    assert out.shape == (N, C_out, H, W)
    # Tolerance loosened for bf16 MXU operands (and bf16 depthwise taps on v6e/v7x);
    # accumulation stays f32.
    assert jnp.allclose(out, ref, atol=5e-2, rtol=5e-2), float(jnp.max(jnp.abs(out - ref)))

    print("KERNEL_OK")
</pallas_src>

<mosaic_0001>
module attributes {stable_mosaic.version = 11 : i64} {
  func.func @_sepconv_kernel(%arg0: i32, %arg1: memref<1x4x256xf32, #tpu.memory_space<vmem>>, %arg2: memref<2x256xi32, #tpu.memory_space<vmem>>, %arg3: memref<9x4x1xf32, #tpu.memory_space<vmem>>, %arg4: memref<4x1xf32, #tpu.memory_space<vmem>>, %arg5: memref<8x4xf32, #tpu.memory_space<vmem>>, %arg6: memref<8x1xf32, #tpu.memory_space<vmem>>, %arg7: memref<1x8x256xf32, #tpu.memory_space<vmem>>) attributes {dimension_semantics = [#tpu.dimension_semantics<parallel>], iteration_bounds = array<i64: 2>, scalar_prefetch = 0 : i64, scratch_operands = 0 : i64, tpu.core_type = #tpu.core_type<tc>, window_params = [{transform_indices = @transform_0, window_bounds = array<i64: 1, 4, 256>}, {pipeline_mode = #tpu.pipeline_mode<synchronous>, transform_indices = @transform_1, window_bounds = array<i64: 2, 256>}, {pipeline_mode = #tpu.pipeline_mode<synchronous>, transform_indices = @transform_2, window_bounds = array<i64: 9, 4, 1>}, {pipeline_mode = #tpu.pipeline_mode<synchronous>, transform_indices = @transform_3, window_bounds = array<i64: 4, 1>}, {pipeline_mode = #tpu.pipeline_mode<synchronous>, transform_indices = @transform_4, window_bounds = array<i64: 8, 4>}, {pipeline_mode = #tpu.pipeline_mode<synchronous>, transform_indices = @transform_5, window_bounds = array<i64: 8, 1>}, {transform_indices = @transform_6, window_bounds = array<i64: 1, 8, 256>}]} {
    %c0 = arith.constant 0 : index
    %c0_0 = arith.constant 0 : index
    %c0_1 = arith.constant 0 : index
    %0 = vector.load %arg1[%c0, %c0_0, %c0_1] : memref<1x4x256xf32, #tpu.memory_space<vmem>>, vector<1x4x256xf32>
    %1 = vector.shape_cast %0 : vector<1x4x256xf32> to vector<4x256xf32>
    %c0_2 = arith.constant 0 : index
    %c0_3 = arith.constant 0 : index
    %2 = vector.load %arg2[%c0_2, %c0_3] : memref<2x256xi32, #tpu.memory_space<vmem>>, vector<1x256xi32>
    %c1 = arith.constant 1 : index
    %c0_4 = arith.constant 0 : index
    %3 = vector.load %arg2[%c1, %c0_4] : memref<2x256xi32, #tpu.memory_space<vmem>>, vector<1x256xi32>
    %c1_i32 = arith.constant 1 : i32
    %4 = vector.broadcast %c1_i32 : i32 to vector<1x256xi32>
    %5 = arith.cmpi sge, %3, %4 : vector<1x256xi32>
    %c15_i32 = arith.constant 15 : i32
    %6 = vector.broadcast %c15_i32 : i32 to vector<1x256xi32>
    %7 = arith.cmpi slt, %3, %6 : vector<1x256xi32>
    %c1_i32_5 = arith.constant 1 : i32
    %8 = vector.broadcast %c1_i32_5 : i32 to vector<1x256xi32>
    %9 = arith.cmpi sge, %2, %8 : vector<1x256xi32>
    %c15_i32_6 = arith.constant 15 : i32
    %10 = vector.broadcast %c15_i32_6 : i32 to vector<1x256xi32>
    %11 = arith.cmpi slt, %2, %10 : vector<1x256xi32>
    %cst = arith.constant 0.000000e+00 : f32
    %12 = vector.broadcast %cst : f32 to vector<4x256xf32>
    %c17_i32 = arith.constant 17 : i32
    %13 = tpu.dynamic_rotate %1 by %c17_i32 dim 1 : vector<4x256xf32>, i32 -> vector<4x256xf32>
    %14 = arith.andi %5, %9 : vector<1x256xi1>
    %cst_7 = arith.constant 0.000000e+00 : f32
    %15 = vector.shape_cast %14 : vector<1x256xi1> to vector<1x256xi1>
    %16 = vector.broadcast %15 : vector<1x256xi1> to vector<4x256xi1>
    %17 = vector.broadcast %cst_7 : f32 to vector<4x256xf32>
    %18 = arith.select %16, %13, %17 : vector<4x256xi1>, vector<4x256xf32>
    %c0_8 = arith.constant 0 : index
    %c0_9 = arith.constant 0 : index
    %c0_10 = arith.constant 0 : index
    %19 = vector.load %arg3[%c0_8, %c0_9, %c0_10] : memref<9x4x1xf32, #tpu.memory_space<vmem>>, vector<1x4x1xf32>
    %20 = vector.shape_cast %19 : vector<1x4x1xf32> to vector<4x1xf32>
    %21 = vector.broadcast %20 : vector<4x1xf32> to vector<4x256xf32>
    %22 = arith.mulf %18, %21 : vector<4x256xf32>
    %23 = arith.addf %12, %22 : vector<4x256xf32>
    %c16_i32 = arith.constant 16 : i32
    %24 = tpu.dynamic_rotate %1 by %c16_i32 dim 1 : vector<4x256xf32>, i32 -> vector<4x256xf32>
    %cst_11 = arith.constant 0.000000e+00 : f32
    %25 = vector.shape_cast %9 : vector<1x256xi1> to vector<1x256xi1>
    %26 = vector.broadcast %25 : vector<1x256xi1> to vector<4x256xi1>
    %27 = vector.broadcast %cst_11 : f32 to vector<4x256xf32>
    %28 = arith.select %26, %24, %27 : vector<4x256xi1>, vector<4x256xf32>
    %c1_12 = arith.constant 1 : index
    %c0_13 = arith.constant 0 : index
    %c0_14 = arith.constant 0 : index
    %29 = vector.load %arg3[%c1_12, %c0_13, %c0_14] : memref<9x4x1xf32, #tpu.memory_space<vmem>>, vector<1x4x1xf32>
    %30 = vector.shape_cast %29 : vector<1x4x1xf32> to vector<4x1xf32>
    %31 = vector.broadcast %30 : vector<4x1xf32> to vector<4x256xf32>
    %32 = arith.mulf %28, %31 : vector<4x256xf32>
    %33 = arith.addf %23, %32 : vector<4x256xf32>
    %c15_i32_15 = arith.constant 15 : i32
    %34 = tpu.dynamic_rotate %1 by %c15_i32_15 dim 1 : vector<4x256xf32>, i32 -> vector<4x256xf32>
    %35 = arith.andi %7, %9 : vector<1x256xi1>
    %cst_16 = arith.constant 0.000000e+00 : f32
    %36 = vector.shape_cast %35 : vector<1x256xi1> to vector<1x256xi1>
    %37 = vector.broadcast %36 : vector<1x256xi1> to vector<4x256xi1>
    %38 = vector.broadcast %cst_16 : f32 to vector<4x256xf32>
    %39 = arith.select %37, %34, %38 : vector<4x256xi1>, vector<4x256xf32>
    %c2 = arith.constant 2 : index
    %c0_17 = arith.constant 0 : index
    %c0_18 = arith.constant 0 : index
    %40 = vector.load %arg3[%c2, %c0_17, %c0_18] : memref<9x4x1xf32, #tpu.memory_space<vmem>>, vector<1x4x1xf32>
    %41 = vector.shape_cast %40 : vector<1x4x1xf32> to vector<4x1xf32>
    %42 = vector.broadcast %41 : vector<4x1xf32> to vector<4x256xf32>
    %43 = arith.mulf %39, %42 : vector<4x256xf32>
    %44 = arith.addf %33, %43 : vector<4x256xf32>
    %c1_i32_19 = arith.constant 1 : i32
    %45 = tpu.dynamic_rotate %1 by %c1_i32_19 dim 1 : vector<4x256xf32>, i32 -> vector<4x256xf32>
    %cst_20 = arith.constant 0.000000e+00 : f32
    %46 = vector.shape_cast %5 : vector<1x256xi1> to vector<1x256xi1>
    %47 = vector.broadcast %46 : vector<1x256xi1> to vector<4x256xi1>
    %48 = vector.broadcast %cst_20 : f32 to vector<4x256xf32>
    %49 = arith.select %47, %45, %48 : vector<4x256xi1>, vector<4x256xf32>
    %c3 = arith.constant 3 : index
    %c0_21 = arith.constant 0 : index
    %c0_22 = arith.constant 0 : index
    %50 = vector.load %arg3[%c3, %c0_21, %c0_22] : memref<9x4x1xf32, #tpu.memory_space<vmem>>, vector<1x4x1xf32>
    %51 = vector.shape_cast %50 : vector<1x4x1xf32> to vector<4x1xf32>
    %52 = vector.broadcast %51 : vector<4x1xf32> to vector<4x256xf32>
    %53 = arith.mulf %49, %52 : vector<4x256xf32>
    %54 = arith.addf %44, %53 : vector<4x256xf32>
    %c4 = arith.constant 4 : index
    %c0_23 = arith.constant 0 : index
    %c0_24 = arith.constant 0 : index
    %55 = vector.load %arg3[%c4, %c0_23, %c0_24] : memref<9x4x1xf32, #tpu.memory_space<vmem>>, vector<1x4x1xf32>
    %56 = vector.shape_cast %55 : vector<1x4x1xf32> to vector<4x1xf32>
    %57 = vector.broadcast %56 : vector<4x1xf32> to vector<4x256xf32>
    %58 = arith.mulf %1, %57 : vector<4x256xf32>
    %59 = arith.addf %54, %58 : vector<4x256xf32>
    %c255_i32 = arith.constant 255 : i32
    %60 = tpu.dynamic_rotate %1 by %c255_i32 dim 1 : vector<4x256xf32>, i32 -> vector<4x256xf32>
    %cst_25 = arith.constant 0.000000e+00 : f32
    %61 = vector.shape_cast %7 : vector<1x256xi1> to vector<1x256xi1>
    %62 = vector.broadcast %61 : vector<1x256xi1> to vector<4x256xi1>
    %63 = vector.broadcast %cst_25 : f32 to vector<4x256xf32>
    %64 = arith.select %62, %60, %63 : vector<4x256xi1>, vector<4x256xf32>
    %c5 = arith.constant 5 : index
    %c0_26 = arith.constant 0 : index
    %c0_27 = arith.constant 0 : index
    %65 = vector.load %arg3[%c5, %c0_26, %c0_27] : memref<9x4x1xf32, #tpu.memory_space<vmem>>, vector<1x4x1xf32>
    %66 = vector.shape_cast %65 : vector<1x4x1xf32> to vector<4x1xf32>
    %67 = vector.broadcast %66 : vector<4x1xf32> to vector<4x256xf32>
    %68 = arith.mulf %64, %67 : vector<4x256xf32>
    %69 = arith.addf %59, %68 : vector<4x256xf32>
    %c241_i32 = arith.constant 241 : i32
    %70 = tpu.dynamic_rotate %1 by %c241_i32 dim 1 : vector<4x256xf32>, i32 -> vector<4x256xf32>
    %71 = arith.andi %5, %11 : vector<1x256xi1>
    %cst_28 = arith.constant 0.000000e+00 : f32
    %72 = vector.shape_cast %71 : vector<1x256xi1> to vector<1x256xi1>
    %73 = vector.broadcast %72 : vector<1x256xi1> to vector<4x256xi1>
    %74 = vector.broadcast %cst_28 : f32 to vector<4x256xf32>
    %75 = arith.select %73, %70, %74 : vector<4x256xi1>, vector<4x256xf32>
    %c6 = arith.constant 6 : index
    %c0_29 = arith.constant 0 : index
    %c0_30 = arith.constant 0 : index
    %76 = vector.load %arg3[%c6, %c0_29, %c0_30] : memref<9x4x1xf32, #tpu.memory_space<vmem>>, vector<1x4x1xf32>
    %77 = vector.shape_cast %76 : vector<1x4x1xf32> to vector<4x1xf32>
    %78 = vector.broadcast %77 : vector<4x1xf32> to vector<4x256xf32>
    %79 = arith.mulf %75, %78 : vector<4x256xf32>
    %80 = arith.addf %69, %79 : vector<4x256xf32>
    %c240_i32 = arith.constant 240 : i32
    %81 = tpu.dynamic_rotate %1 by %c240_i32 dim 1 : vector<4x256xf32>, i32 -> vector<4x256xf32>
    %cst_31 = arith.constant 0.000000e+00 : f32
    %82 = vector.shape_cast %11 : vector<1x256xi1> to vector<1x256xi1>
    %83 = vector.broadcast %82 : vector<1x256xi1> to vector<4x256xi1>
    %84 = vector.broadcast %cst_31 : f32 to vector<4x256xf32>
    %85 = arith.select %83, %81, %84 : vector<4x256xi1>, vector<4x256xf32>
    %c7 = arith.constant 7 : index
    %c0_32 = arith.constant 0 : index
    %c0_33 = arith.constant 0 : index
    %86 = vector.load %arg3[%c7, %c0_32, %c0_33] : memref<9x4x1xf32, #tpu.memory_space<vmem>>, vector<1x4x1xf32>
    %87 = vector.shape_cast %86 : vector<1x4x1xf32> to vector<4x1xf32>
    %88 = vector.broadcast %87 : vector<4x1xf32> to vector<4x256xf32>
    %89 = arith.mulf %85, %88 : vector<4x256xf32>
    %90 = arith.addf %80, %89 : vector<4x256xf32>
    %c239_i32 = arith.constant 239 : i32
    %91 = tpu.dynamic_rotate %1 by %c239_i32 dim 1 : vector<4x256xf32>, i32 -> vector<4x256xf32>
    %92 = arith.andi %7, %11 : vector<1x256xi1>
    %cst_34 = arith.constant 0.000000e+00 : f32
    %93 = vector.shape_cast %92 : vector<1x256xi1> to vector<1x256xi1>
    %94 = vector.broadcast %93 : vector<1x256xi1> to vector<4x256xi1>
    %95 = vector.broadcast %cst_34 : f32 to vector<4x256xf32>
    %96 = arith.select %94, %91, %95 : vector<4x256xi1>, vector<4x256xf32>
    %c8 = arith.constant 8 : index
    %c0_35 = arith.constant 0 : index
    %c0_36 = arith.constant 0 : index
    %97 = vector.load %arg3[%c8, %c0_35, %c0_36] : memref<9x4x1xf32, #tpu.memory_space<vmem>>, vector<1x4x1xf32>
    %98 = vector.shape_cast %97 : vector<1x4x1xf32> to vector<4x1xf32>
    %99 = vector.broadcast %98 : vector<4x1xf32> to vector<4x256xf32>
    %100 = arith.mulf %96, %99 : vector<4x256xf32>
    %101 = arith.addf %90, %100 : vector<4x256xf32>
    %c0_37 = arith.constant 0 : index
    %c0_38 = arith.constant 0 : index
    %102 = vector.load %arg4[%c0_37, %c0_38] : memref<4x1xf32, #tpu.memory_space<vmem>>, vector<4x1xf32>
    %103 = vector.broadcast %102 : vector<4x1xf32> to vector<4x256xf32>
    %104 = arith.addf %101, %103 : vector<4x256xf32>
    %105 = arith.truncf %104 : vector<4x256xf32> to vector<4x256xbf16>
    %c0_39 = arith.constant 0 : index
    %c0_40 = arith.constant 0 : index
    %106 = vector.load %arg5[%c0_39, %c0_40] : memref<8x4xf32, #tpu.memory_space<vmem>>, vector<8x4xf32>
    %107 = arith.truncf %106 : vector<8x4xf32> to vector<8x4xbf16>
    %c0_41 = arith.constant 0 : index
    %c0_42 = arith.constant 0 : index
    %108 = vector.load %arg6[%c0_41, %c0_42] : memref<8x1xf32, #tpu.memory_space<vmem>>, vector<8x1xf32>
    %cst_43 = arith.constant dense<0.000000e+00> : vector<8x256xf32>
    %109 = tpu.matmul %107, %105, %cst_43 {dimension_numbers = #tpu.dot_dimension_numbers<[1], [0], [0], [1], [0, 0, 1, 1], [], []>} : vector<8x4xbf16>, vector<4x256xbf16>, vector<8x256xf32> -> vector<8x256xf32>
    %110 = vector.broadcast %108 : vector<8x1xf32> to vector<8x256xf32>
    %111 = arith.addf %109, %110 : vector<8x256xf32>
    %c0_44 = arith.constant 0 : index
    %c0_45 = arith.constant 0 : index
    %c0_46 = arith.constant 0 : index
    %112 = vector.load %arg7[%c0_44, %c0_45, %c0_46] : memref<1x8x256xf32, #tpu.memory_space<vmem>>, vector<1x8x256xf32>
    %113 = vector.shape_cast %112 : vector<1x8x256xf32> to vector<8x256xf32>
    %114 = vector.shape_cast %111 : vector<8x256xf32> to vector<1x8x256xf32>
    tpu.vector_store %arg7[%c0_44, %c0_45, %c0_46], %114 {strides = array<i32>} : memref<1x8x256xf32, #tpu.memory_space<vmem>>, vector<1x8x256xf32>,
    return
  }
  func.func @transform_0(%arg0: i32) -> (i32, i32, i32) {
    %c0_i32 = arith.constant 0 : i32
    %c0_i32_0 = arith.constant 0 : i32
    %c0_i32_1 = arith.constant 0 : i32
    return %arg0, %c0_i32, %c0_i32_0 : i32, i32, i32
  }
  func.func @transform_1(%arg0: i32) -> (i32, i32) {
    %c0_i32 = arith.constant 0 : i32
    %c0_i32_0 = arith.constant 0 : i32
    %c0_i32_1 = arith.constant 0 : i32
    return %c0_i32, %c0_i32_0 : i32, i32
  }
  func.func @transform_2(%arg0: i32) -> (i32, i32, i32) {
    %c0_i32 = arith.constant 0 : i32
    %c0_i32_0 = arith.constant 0 : i32
    %c0_i32_1 = arith.constant 0 : i32
    %c0_i32_2 = arith.constant 0 : i32
    return %c0_i32, %c0_i32_0, %c0_i32_1 : i32, i32, i32
  }
  func.func @transform_3(%arg0: i32) -> (i32, i32) {
    %c0_i32 = arith.constant 0 : i32
    %c0_i32_0 = arith.constant 0 : i32
    %c0_i32_1 = arith.constant 0 : i32
    return %c0_i32, %c0_i32_0 : i32, i32
  }
  func.func @transform_4(%arg0: i32) -> (i32, i32) {
    %c0_i32 = arith.constant 0 : i32
    %c0_i32_0 = arith.constant 0 : i32
    %c0_i32_1 = arith.constant 0 : i32
    return %c0_i32, %c0_i32_0 : i32, i32
  }
  func.func @transform_5(%arg0: i32) -> (i32, i32) {
    %c0_i32 = arith.constant 0 : i32
    %c0_i32_0 = arith.constant 0 : i32
    %c0_i32_1 = arith.constant 0 : i32
    return %c0_i32, %c0_i32_0 : i32, i32
  }
  func.func @transform_6(%arg0: i32) -> (i32, i32, i32) {
    %c0_i32 = arith.constant 0 : i32
    %c0_i32_0 = arith.constant 0 : i32
    %c0_i32_1 = arith.constant 0 : i32
    return %arg0, %c0_i32, %c0_i32_0 : i32, i32, i32
  }
}

</mosaic_0001>

<bundles_post_ra>
// kernel: seperable_conv2d.1
= control target key start
LH: loop header
LB: loop body
LE: loop exit
PB: predicated region body
PF: predicated region fallthrough
CT: control target
= control target key end

     0   :  { %s762_s21 = smov 0   ;;  %s1052_s0 = inlined_call_operand.vmem [shape: f32[2,4,256], index: 0, kind: input, shape index: {}]   ;;  %s1053_s1 = inlined_call_operand.vmem [shape: s32[2,256], index: 1, kind: input, shape index: {}]   ;;  %s1054_s2 = inlined_call_operand.vmem [shape: f32[9,4,1], index: 2, kind: input, shape index: {}]   ;;  %s1055_s3 = inlined_call_operand.vmem [shape: f32[4,1], index: 3, kind: input, shape index: {}]   ;;  %s1056_s4 = inlined_call_operand.vmem [shape: f32[8,4], index: 4, kind: input, shape index: {}]   ;;  %s1057_s5 = inlined_call_operand.vmem [shape: f32[8,1], index: 5, kind: input, shape index: {}]   ;;  %s1058_s6 = inlined_call_operand.vmem [shape: f32[2,8,256], index: 6, kind: output, shape index: {}]  }
   0x1 LB: > { %s664_s22 = sadd.s32 4294967295, %s715_s21   ;;  %p668_p0 = scmp.ge.s32.totalorder %s715_s21, 1  ;;  %s715_s21 = sphi %s762_s21, %s16_s21  }
   0x2   : > { %p212_p1 = scmp.lt.s32.totalorder %s715_s21, 3 }
   0x4   : > { %p213_p2 = pnand %p668_p0, %p212_p1 }
   0x5   : > { %v675_v0 = vld [vmem:[%s1054_s2 + $0x8] sm:$0xf] (!%p213_p2)  ;;  %v287_v1 = vld [vmem:[%s1054_s2] sm:$0xf] (!%p213_p2)  ;;  %p242_p3 = scmp.lt.s32.totalorder (!%p213_p2), %s664_s22, 1  ;;  %v717_v2 = vmov (!%p213_p2), 0   ;;  %v268_v22 = vlaneseq (!%p213_p2) }
   0x6   : > { %216 = sbr.rel (%p213_p2) target bundleno = 415 (0x19f), region = 44  ;;  %707 = vset.pattern.permute.xlu1 (!%p213_p2), %v717_v2  ;;  %706 = vset.pattern.permute.xlu0 (!%p213_p2), %v717_v2  ;;  %v677_v3 = vld [vmem:[%s1054_s2 + $0x10] sm:$0xf] (!%p213_p2)  ;;  %v674_v4 = vld [vmem:[%s1054_s2 + $0x4] sm:$0xf] (!%p213_p2)  ;;  %s718_s13 = smov (!%p213_p2), 17  }
   0x7   : > { %353 = vperm.xlu1 (!%p213_p2), %707, %v675_v0   ;;  %290 = vperm.xlu0 (!%p213_p2), %706, %v287_v1   ;;  %v676_v5 = vld [vmem:[%s1054_s2 + $0xc] sm:$0xf] (!%p213_p2)  ;;  %s719_s14 = smov (!%p213_p2), 16   ;;  %s720_s15 = smov (!%p213_p2), 15   ;;  %v678_v8 = vld [vmem:[%s1054_s2 + $0x14] sm:$0xf] (!%p213_p2) }
   0x8   : > { %598 = vmatprep.mubr.bf16.mxu0 (!%p213_p2), %v717_v2  ;;  %s721_s18 = smov (!%p213_p2), 1   ;;  %v680_v9 = vld [vmem:[%s1054_s2 + $0x1c] sm:$0xf] (!%p213_p2)  ;;  %v679_v10 = vld [vmem:[%s1054_s2 + $0x18] sm:$0xf] (!%p213_p2)  ;;  %s722_s25 = smov (!%p213_p2), 127  }
   0x9   : > { %v681_v11 = vld [vmem:[%s1054_s2 + $0x20] sm:$0xf] (!%p213_p2)  ;;  %s723_s28 = smov (!%p213_p2), 113   ;;  %s724_s29 = smov (!%p213_p2), 112   ;;  %v276_v25 = vshrl.u32 (!%p213_p2), %v268_v22, 7  ;;  %v857_v34 = vand.u32 (!%p213_p2), 127, %v268_v22 }
   0xa   : > { %v537_v12 = vld [vmem:[%s1055_s3] sm:$0xf] (!%p213_p2)  ;;  %s725_s8 = smov (!%p213_p2), 111   ;;  %v726_v32 = vmov (!%p213_p2), 839922192  }
   0xb   : > { %395 = vperm.xlu1 (!%p213_p2), %707, %v677_v3   ;;  %321 = vperm.xlu0 (!%p213_p2), %706, %v674_v4   ;;  %v549_v13 = vld [vmem:[%s1057_s5] sm:$0xff] (!%p213_p2)  ;;  %v849_v26 = vsub.s32 (!%p213_p2), 0, %v276_v25  ;;  %v851_v27 = vsub.s32 (!%p213_p2), 1, %v276_v25  ;;  %v398_v33 = vunpack.c.l.s4 (!%p213_p2), %v726_v32  ;;  %vm301_vm5 = vcmp.lt.s32.totalorder (!%p213_p2), %v857_v34, 16 }
   0xc   : > { %v837_v20 = vld [vmem:[%s1053_s1] ss:$2 sm:$0x3] (!%p213_p2)  ;;  %v842_v21 = vld [vmem:[%s1053_s1 + $0x1] ss:$2 sm:$0x3] (!%p213_p2) }
   0xd   : > { %s1092_s22 = smov (!%p242_p3, %s664_s22), 1  ;;  %vm257_vm0 = vcmp.ge.s32.totalorder %v842_v21, 1  ;;  %vm259_vm1 = vcmp.ge.s32.totalorder %v837_v20, 1  ;;  %vm258_vm3 = vcmp.lt.s32.totalorder %v842_v21, 15  ;;  %v399_v45 = vunpack.c.0.s8 %v398_v33 }
   0xe   : > { %s686_s7 = sshll.u32 %s1092_s22, 3  ;;  %vm273_vm2 = vmand %vm257_vm0, %vm259_vm1  ;;  %v304_v31 = vsel %vm259_vm1, 1, %v717_v2  ;;  %v367_v42 = vsel %vm257_vm0, 1, %v717_v2  ;;  %vm270_vm6 = vcmp.lt.s32.totalorder %v857_v34, 17  ;;  %vm332_vm11 = vcmp.lt.s32.totalorder %v857_v34, 15  ;;  %s687_s17 = sshll.u32 %s1092_s22, 4 }
   0xf   : > { %s246_s10 = scalar_lea.vmem %s1052_s0, %s686_s7  ;;  %384 = vperm.xlu0 %706, %v676_v5   ;;  %v274_v30 = vsel %vm273_vm2, 1, %v717_v2  ;;  %vm335_vm4 = vmand %vm258_vm3, %vm259_vm1  ;;  %v308_v40 = vrot.slane %v304_v31, %v849_v26  ;;  %v312_v41 = vrot.slane %v304_v31, %v851_v27  ;;  %v371_v52 = vrot.slane %v367_v42, %v849_v26  ;;  %s251_s20 = scalar_lea.vmem %s1058_s6, %s687_s17 }
  0x10   : > { %v794_v6 = vld [vmem:[%s246_s10] sm:$0xff]  ;;  %v278_v35 = vrot.slane %v274_v30, %v849_v26  ;;  %v282_v36 = vrot.slane %v274_v30, %v851_v27  ;;  %v336_v38 = vsel %vm335_vm4, 1, %v717_v2  ;;  %v375_v55 = vrot.slane %v367_v42, %v851_v27 }
  0x11   : > { %264 = vrot.lane.b32.xlu1 %v794_v6, %s718_s13  ;;  %v262_v7 = vcombine.high %v794_v6, %v794_v6  ;;  %v340_v43 = vrot.slane %v336_v38, %v849_v26  ;;  %v344_v44 = vrot.slane %v336_v38, %v851_v27  ;;  %vm881_vm9 = vcmp.eq.s32.totalorder %v308_v40, 1 }
  0x12   : > { %vm873_vm7 = vcmp.eq.s32.totalorder %v278_v35, 1  ;;  %vm877_vm8 = vcmp.eq.s32.totalorder %v282_v36, 1  ;;  %vm885_vm10 = vcmp.eq.s32.totalorder %v312_v41, 1  ;;  %vm260_vm12 = vcmp.lt.s32.totalorder %v837_v20, 15 }
  0x13   : > { %266 = vrot.lane.b32.xlu0 %v262_v7, %s718_s13  ;;  %vm893_vm13 = vcmp.eq.s32.totalorder %v340_v43, 1  ;;  %vm897_vm14 = vcmp.eq.s32.totalorder %v344_v44, 1  ;;  %vm364_vm15 = vcmp.lt.s32.totalorder %v857_v34, 1  ;;  %v418_v58 = vsel %vm258_vm3, 1, %v717_v2  ;;  %vm449_vm2 = vmand %vm257_vm0, %vm260_vm12 }
  0x14   : > { %v402_v1 = vsub.s32 %v399_v45, %v276_v25  ;;  %vm917_vm1 = vcmp.eq.s32.totalorder %v371_v52, 1  ;;  %vm925_vm4 = vcmp.eq.s32.totalorder %v375_v55, 1  ;;  %v426_v25 = vrot.slane %v418_v58, %v851_v27 }
  0x15   : > { %297 = vrot.lane.b32.xlu1 %v794_v6, %s719_s14  ;;  %vm415_vm0 = vcmp.lt.s32.totalorder %v857_v34, 127  ;;  %v481_v40 = vsel %vm260_vm12, 1, %v717_v2 }
  0x16   : > { %v485_v51 = vrot.slane %v481_v40, %v849_v26  ;;  %v489_v52 = vrot.slane %v481_v40, %v851_v27 }
  0x17   : > { %299 = vrot.lane.b32.xlu0 %v262_v7, %s719_s14 }
  0x19   : > { %328 = vrot.lane.b32.xlu1 %v794_v6, %s720_s15 }
  0x1b   : > { %330 = vrot.lane.b32.xlu0 %v262_v7, %s720_s15 }
  0x1d   : > { %435 = vperm.xlu1 %707, %v678_v8  }
  0x1f   : > { %360 = vrot.lane.b32.xlu0 %v794_v6, %s721_s18 }
  0x21   : > { %362 = vrot.lane.b32.xlu1 %v262_v7, %s721_s18 }
  0x23   : > { %467 = vperm.xlu0 %706, %v679_v10   ;;  %v422_v10 = vrot.slane %v418_v58, %v849_v26 }
  0x25   : > { %498 = vperm.xlu1 %707, %v680_v9  }
  0x27   : > { %411 = vrot.lane.b32.xlu0 %v794_v6, %s722_s25 }
  0x29   : > { %413 = vrot.lane.b32.xlu1 %v262_v7, %s722_s25 }
  0x2b   : > { %530 = vperm.xlu0 %706, %v681_v11  }
  0x2d   : > { %442 = vrot.lane.b32.xlu1 %v794_v6, %s723_s28 }
  0x2f   : > { %444 = vrot.lane.b32.xlu0 %v262_v7, %s723_s28 }
  0x31   : > { %474 = vrot.lane.b32.xlu1 %v794_v6, %s724_s29 }
  0x33   : > { %476 = vrot.lane.b32.xlu0 %v262_v7, %s724_s29 }
  0x35   : > { %540 = vperm.xlu1 %707, %v537_v12  }
  0x37   : > { %505 = vrot.lane.b32.xlu0 %v794_v6, %s725_s8 }
  0x39   : > { %507 = vrot.lane.b32.xlu1 %v262_v7, %s725_s8 }
  0x3b   : > { %552 = vperm.xlu0 %706, %v549_v13  }
  0x86   : > { %v824_v14 = vpop.permute.xlu1 %353  ;;  %v826_v15 = vpop.permute.xlu0 %290 }
  0x8a   : > { %v828_v16 = vpop.permute.xlu1 %395  ;;  %v830_v17 = vpop.permute.xlu0 %321 }
  0x8b   : > { %v403_v30 = vrot.slane %v828_v16, %v402_v1 }
  0x8d   : > { %v405_v21 = vmul.f32 %v403_v30, %v794_v6 }
  0x8e   : > { %v832_v18 = vpop.permute.xlu0 %384  ;;  %v265_v19 = vpop.permute.xlu1 %264 }
  0x92   : > { %v298_v23 = vpop.permute.xlu1 %297  ;;  %v267_v24 = vpop.permute.xlu0 %266 }
  0x93   : > { %v271_v59 = vsel %vm270_vm6, %v265_v19, %v267_v24  ;;  %v272_v60 = vsel %vm270_vm6, %v267_v24, %v265_v19  ;;  %vm512_vm6 = vmand %vm258_vm3, %vm260_vm12  ;;  %vm446_vm3 = vcmp.lt.s32.totalorder %v857_v34, 113  ;;  %vm1009_vm12 = vcmp.eq.s32.totalorder %v489_v52, 1 }
  0x94   : > { %v285_v11 = vsel %vm873_vm7, %v272_v60, 0.0  ;;  %v286_v12 = vsel %vm877_vm8, %v271_v59, 0.0  ;;  %vm967_vm7 = vcmp.eq.s32.totalorder %v426_v25, 1  ;;  %v407_v60 = vcombine.high %v405_v21, %v405_v21 }
  0x95   : > { %v293_v33 = vmul.f32 %v826_v15, %v285_v11 }
  0x96   : > { %v329_v28 = vpop.permute.xlu1 %328  ;;  %v300_v29 = vpop.permute.xlu0 %299 }
  0x97   : > { %v302_v53 = vsel %vm301_vm5, %v298_v23, %v300_v29  ;;  %v303_v54 = vsel %vm301_vm5, %v300_v29, %v298_v23  ;;  %v450_v29 = vsel %vm449_vm2, 1, %v717_v2  ;;  %vm952_vm5 = vcmp.eq.s32.totalorder %v422_v10, 1 }
  0x98   : > { %v315_v3 = vsel %vm881_vm9, %v303_v54, 0.0  ;;  %v316_v4 = vsel %vm885_vm10, %v302_v53, 0.0  ;;  %v454_v16 = vrot.slane %v450_v29, %v849_v26  ;;  %vm478_vm10 = vcmp.lt.s32.totalorder %v857_v34, 112 }
  0x99   : > { %v324_v22 = vmul.f32 %v830_v17, %v315_v3  ;;  %v325_v23 = vmul.f32 %v830_v17, %v316_v4  ;;  %v294_v17 = vmul.f32 %v826_v15, %v286_v12  ;;  %vm555_vm2 = vcmask 31744  }
  0x9a   : > { %v331_v39 = vpop.permute.xlu0 %330  ;;  %vm978_vm8 = vcmp.eq.s32.totalorder %v454_v16, 1 }
  0x9b   : > { %v333_v61 = vsel %vm332_vm11, %v329_v28, %v331_v39  ;;  %v334_v62 = vsel %vm332_vm11, %v331_v39, %v329_v28  ;;  %v458_v39 = vrot.slane %v450_v29, %v851_v27  ;;  %v326_v15 = vadd.f32 %v324_v22, %v293_v33 }
  0x9c   : > { %v861_v37 = vpop.permute.xlu1 %435  ;;  %v347_v13 = vsel %vm893_vm13, %v334_v62, 0.0  ;;  %v348_v19 = vsel %vm897_vm14, %v333_v61, 0.0  ;;  %v327_v41 = vadd.f32 %v325_v23, %v294_v17  ;;  %vm1005_vm11 = vcmp.eq.s32.totalorder %v485_v51, 1 }
  0x9d   : > { %v356_v35 = vmul.f32 %v824_v14, %v347_v13  ;;  %v357_v36 = vmul.f32 %v824_v14, %v348_v19  ;;  %vm982_vm9 = vcmp.eq.s32.totalorder %v458_v39, 1  ;;  %vm509_vm13 = vcmp.lt.s32.totalorder %v857_v34, 111  ;;  %v547_v34 = vld [vmem:[%s1056_s4] sm:$0xff] }
  0x9e   : > { %v361_v49 = vpop.permute.xlu0 %360 }
  0x9f   : > { %v358_v47 = vadd.f32 %v356_v35, %v326_v15 }
  0xa0   : > { %v363_v48 = vpop.permute.xlu1 %362 }
  0xa1   : > { %v365_v8 = vsel %vm364_vm15, %v361_v49, %v363_v48  ;;  %v366_v9 = vsel %vm364_vm15, %v363_v48, %v361_v49  ;;  %v359_v48 = vadd.f32 %v357_v36, %v327_v41 }
  0xa2   : > { %v911_v0 = vpop.permute.xlu0 %467  ;;  %v378_v31 = vsel %vm917_vm1, %v366_v9, 0.0  ;;  %v379_v32 = vsel %vm925_vm4, %v365_v8, 0.0  ;;  %vm559_vm1 = vcmask 1041408  }
  0xa3   : > { %v387_v14 = vmul.f32 %v832_v18, %v378_v31  ;;  %v388_v42 = vmul.f32 %v832_v18, %v379_v32  ;;  %v513_v18 = vsel %vm512_vm6, 1, %v717_v2 }
  0xa4   : > { %v909_v63 = vpop.permute.xlu1 %498  ;;  %v517_v59 = vrot.slane %v513_v18, %v849_v26  ;;  %v521_v1 = vrot.slane %v513_v18, %v851_v27 }
  0xa5   : > { %v389_v53 = vadd.f32 %v387_v14, %v358_v47  ;;  %v390_v54 = vadd.f32 %v388_v42, %v359_v48 }
  0xa6   : > { %v412_v28 = vpop.permute.xlu0 %411  ;;  %vm1024_vm14 = vcmp.eq.s32.totalorder %v517_v59, 1  ;;  %vm1028_vm15 = vcmp.eq.s32.totalorder %v521_v1, 1 }
  0xa7   : > { %v409_v26 = vadd.f32 %v405_v21, %v389_v53  ;;  %v410_v8 = vadd.f32 %v407_v60, %v390_v54 }
  0xa8   : > { %v414_v24 = vpop.permute.xlu1 %413 }
  0xa9   : > { %v416_v46 = vsel %vm415_vm0, %v412_v28, %v414_v24  ;;  %v417_v20 = vsel %vm415_vm0, %v414_v24, %v412_v28 }
  0xaa   : > { %v531_v44 = vpop.permute.xlu0 %530  ;;  %v429_v6 = vsel %vm952_vm5, %v416_v46, 0.0  ;;  %v430_v2 = vsel %vm967_vm7, %v417_v20, 0.0  ;;  %v548_v46 = vpack.c.bf16 %v547_v34, %v547_v34 }
  0xab   : > { %v438_v3 = vmul.f32 %v861_v37, %v429_v6  ;;  %v439_v4 = vmul.f32 %v861_v37, %v430_v2 }
  0xac   : > { %v443_v43 = vpop.permute.xlu1 %442 }
  0xad   : > { %v441_v24 = vadd.f32 %v439_v4, %v410_v8 }
  0xae   : > { %v445_v56 = vpop.permute.xlu0 %444 }
  0xaf   : > { %v447_v57 = vsel %vm446_vm3, %v443_v43, %v445_v56  ;;  %v448_v58 = vsel %vm446_vm3, %v445_v56, %v443_v43 }
  0xb0   : > { %v475_v55 = vpop.permute.xlu1 %474  ;;  %v461_v61 = vsel %vm978_vm8, %v447_v57, 0.0  ;;  %v462_v62 = vsel %vm982_vm9, %v448_v58, 0.0 }
  0xb1   : > { %v470_v27 = vmul.f32 %v911_v0, %v461_v61  ;;  %v471_v11 = vmul.f32 %v911_v0, %v462_v62  ;;  %v440_v0 = vadd.f32 %v438_v3, %v409_v26 }
  0xb2   : > { %v477_v10 = vpop.permute.xlu0 %476 }
  0xb3   : > { %v479_v37 = vsel %vm478_vm10, %v475_v55, %v477_v10  ;;  %v480_v12 = vsel %vm478_vm10, %v477_v10, %v475_v55  ;;  %v472_v31 = vadd.f32 %v470_v27, %v440_v0  ;;  %v473_v32 = vadd.f32 %v471_v11, %v441_v24 }
  0xb4   : > { %v541_v9 = vpop.permute.xlu1 %540  ;;  %v492_v13 = vsel %vm1005_vm11, %v479_v37, 0.0  ;;  %v493_v19 = vsel %vm1009_vm12, %v480_v12, 0.0 }
  0xb5   : > { %v501_v25 = vmul.f32 %v909_v63, %v492_v13  ;;  %v502_v28 = vmul.f32 %v909_v63, %v493_v19 }
  0xb6   : > { %v506_v30 = vpop.permute.xlu0 %505 }
  0xb7   : > { %v503_v38 = vadd.f32 %v501_v25, %v472_v31  ;;  %v504_v16 = vadd.f32 %v502_v28, %v473_v32 }
  0xb8   : > { %v508_v29 = vpop.permute.xlu1 %507 }
  0xb9   : > { %v510_v33 = vsel %vm509_vm13, %v506_v30, %v508_v29  ;;  %v511_v17 = vsel %vm509_vm13, %v508_v29, %v506_v30 }
  0xba   : > { %v524_v35 = vsel %vm1024_vm14, %v510_v33, 0.0  ;;  %v525_v36 = vsel %vm1028_vm15, %v511_v17, 0.0  ;;  %v553_v20 = vpop.permute.xlu0 %552 }
  0xbb   : > { %v533_v39 = vmul.f32 %v531_v44, %v524_v35  ;;  %v534_v63 = vmul.f32 %v531_v44, %v525_v36 }
  0xbd   : > { %v536_v40 = vadd.f32 %v534_v63, %v504_v16  ;;  %v535_v15 = vadd.f32 %v533_v39, %v503_v38 }
  0xbf   : > { %v544_v41 = vadd.f32 %v541_v9, %v536_v40  ;;  %v543_v14 = vadd.f32 %v541_v9, %v535_v15 }
  0xc1   : > { %v546_v42 = vpack.c.bf16 %v544_v41, %v544_v41  ;;  %v545_v43 = vpack.c.bf16 %v543_v14, %v543_v14 }
  0xc3   : > { %682 = vmatprep.subr.msk.bf16.mxu0 %vm559_vm1, %v546_v42  ;;  %v561_v45 = vsel %vm559_vm1, %v545_v43, 0 }
  0xc4   : > { %567 = vmatpush1.bf16.msra.mxu0 %v561_v45 }
  0xc7   : > { %683 = vmatmul.mubr.msk.bf16.vlgmr.msra.gmra.mrb[0].mxu0 %vm555_vm2, %v548_v46 }
 0x19a   : > { %v600_v44 = vpop.f32.mrb[0].mxu0 }
 0x19b   : > { %v601_v21 = vadd.f32 %v600_v44, %v553_v20  ;;  %v602_v47 = vpop.f32.mrb[1].mxu0 }
 0x19c   : > { %v603_v48 = vadd.f32 %v602_v47, %v553_v20  ;;  %v604_v18 = vpop.f32.mrb[2].mxu0 }
 0x19d   : > { %607 = vst [vmem:[%s251_s20] sm:$0xff] %v601_v21  ;;  %v605_v49 = vpop.f32.mrb[3].mxu0 }
 0x19e   : > { %608 = vst [vmem:[%s251_s20 + $0x8] sm:$0xff] %v603_v48 }
 0x19f PF: > { %s16_s21 = sadd.s32 1, %s715_s21  }
 0x1a0   : > { %p13_p4 = scmp.ge.s32.totalorder %s16_s21, 4  }
 0x1a2   :  { %15 = sbr.rel (!%p13_p4) target bundleno = 1 (0x1), region = 83 }

</bundles_post_ra>
